<compile_context>
chip_gen: v6e
topology: v6e:2x2x1
jax: 0.10.0
libtpu: 0.0.40
codegen_flags: <defaults>
</compile_context>

<pallas_src>
import jax
import jax.numpy as jnp
from jax.experimental import pallas as pl
from jax.experimental.pallas import tpu as pltpu


def _copy_kernel(x_ref, o_ref):
    # Identity tile copy: input and output block shapes match exactly.
    o_ref[...] = x_ref[...]


def _round_up(v: int, m: int) -> int:
    return ((v + m - 1) // m) * m


def chomp1d(x: jax.Array, chomp_size: int) -> jax.Array:
    """Pallas implementation of Chomp1d: x[:, :, :-chomp_size]."""
    # PyTorch's x[:, :, :-0] would be empty; the module is only meaningful
    # with chomp_size > 0 (it equals (kernel_size - 1) * dilation in TCNs).
    assert chomp_size > 0, "chomp_size must be positive"
    n, c, l = x.shape
    l_out = l - chomp_size
    assert l_out > 0, "chomp_size must be smaller than the temporal length"

    r = n * c
    x2 = x.reshape(r, l)  # flatten batch*channels into a single row axis

    itemsize = jnp.dtype(x.dtype).itemsize
    # Sublane packing granularity: 8 rows (f32), 16 (bf16/f16), 32 (int8/fp8).
    sublane = 8 * max(1, 4 // itemsize)

    # Row tile: as many rows as available, capped at 512 (multiple of every
    # sublane granularity).
    tile_r = min(_round_up(r, sublane), 512)

    # Lane tile: lane-dense (multiple of 128) and sized so one block carries
    # ~2 MiB — large enough to sit near the HBM roofline, small enough that
    # the double-buffered in+out footprint (~4x) stays well under scoped VMEM.
    target_block_bytes = 2 * 1024 * 1024
    max_l_by_budget = max(128, (target_block_bytes // (tile_r * itemsize)) // 128 * 128)
    tile_l = min(_round_up(l_out, 128), max_l_by_budget)

    grid = (pl.cdiv(r, tile_r), pl.cdiv(l_out, tile_l))

    out2 = pl.pallas_call(
        _copy_kernel,
        out_shape=jax.ShapeDtypeStruct((r, l_out), x.dtype),
        grid_spec=pltpu.PrefetchScalarGridSpec(
            num_scalar_prefetch=0,
            grid=grid,
            # Input tiled over L_out (same block indices as the output), so the
            # chomped tail is never read; any over-read on the last partial
            # tile is padded and the corresponding output lanes are masked.
            in_specs=[pl.BlockSpec((tile_r, tile_l), lambda i, j: (i, j))],
            out_specs=pl.BlockSpec((tile_r, tile_l), lambda i, j: (i, j)),
        ),
        compiler_params=pltpu.CompilerParams(
            dimension_semantics=("parallel", "parallel"),
            vmem_limit_bytes=32 * 1024 * 1024,
        ),
    )(x2)

    return out2.reshape(n, c, l_out)


if __name__ == "__main__":
    key = jax.random.PRNGKey(0)
    # Small shape consistent with a Conv1d/TCN pipeline: (batch, channels, length)
    N, C, L = 2, 4, 16
    chomp_size = 3  # e.g. (kernel_size - 1) * dilation of a causal conv

    x = jax.random.normal(key, (N, C, L), dtype=jnp.float32)
    y = jax.block_until_ready(chomp1d(x, chomp_size))

    y_ref = x[:, :, :-chomp_size]
    assert y.shape == (N, C, L - chomp_size), y.shape
    assert jnp.array_equal(y, y_ref), "f32 mismatch vs reference slice"

    # bf16 path (exercises sublane packing + masked ragged edge).
    xb = x.astype(jnp.bfloat16)
    yb = jax.block_until_ready(chomp1d(xb, chomp_size))
    assert jnp.array_equal(yb, xb[:, :, :-chomp_size]), "bf16 mismatch"

    print("KERNEL_OK")
</pallas_src>

<mosaic_0001>
module attributes {stable_mosaic.version = 11 : i64} {
  func.func @_copy_kernel(%arg0: i32, %arg1: i32, %arg2: memref<8x128xf32, #tpu.memory_space<vmem>>, %arg3: memref<8x128xf32, #tpu.memory_space<vmem>>) attributes {dimension_semantics = [#tpu.dimension_semantics<parallel>, #tpu.dimension_semantics<parallel>], iteration_bounds = array<i64: 1, 1>, scalar_prefetch = 0 : i64, scratch_operands = 0 : i64, tpu.core_type = #tpu.core_type<tc>, window_params = [{transform_indices = @transform_0, window_bounds = array<i64: 8, 128>}, {transform_indices = @transform_1, window_bounds = array<i64: 8, 128>}]} {
    %c0 = arith.constant 0 : index
    %c0_0 = arith.constant 0 : index
    %0 = vector.load %arg2[%c0, %c0_0] : memref<8x128xf32, #tpu.memory_space<vmem>>, vector<8x128xf32>
    %c0_1 = arith.constant 0 : index
    %c0_2 = arith.constant 0 : index
    %1 = vector.load %arg3[%c0_1, %c0_2] : memref<8x128xf32, #tpu.memory_space<vmem>>, vector<8x128xf32>
    tpu.vector_store %arg3[%c0_1, %c0_2], %0 {strides = array<i32>} : memref<8x128xf32, #tpu.memory_space<vmem>>, vector<8x128xf32>,
    return
  }
  func.func @transform_0(%arg0: i32, %arg1: i32) -> (i32, i32) {
    %c0_i32 = arith.constant 0 : i32
    return %arg0, %arg1 : i32, i32
  }
  func.func @transform_1(%arg0: i32, %arg1: i32) -> (i32, i32) {
    %c0_i32 = arith.constant 0 : i32
    return %arg0, %arg1 : i32, i32
  }
}

</mosaic_0001>

<bundles_post_ra>
// kernel: tpu_custom_call.1
= control target key start
LH: loop header
LB: loop body
LE: loop exit
PB: predicated region body
PF: predicated region fallthrough
CT: control target
= control target key end

     0   :  { %6 = vsyncpa [#allocation3], 0  ;;  %s102_s0 = inlined_call_operand.hbm [shape: f32[8,16], index: 0, kind: input, shape index: {}]   ;;  %s103_s1 = inlined_call_operand.hbm [shape: f32[8,13], index: 1, kind: output, shape index: {}]  }
   0x1   :  { %7 = vsyncpa [#allocation4], 0  ;;  %s84_s6 = smov [#allocation2]  }
   0x2   :  { %s14_s7 = sshll.u32 %s84_s6, 4  ;;  %s15_s7 = int_to_ptr.vmem [resolvable:$true] %s14_s7 }
   0x3   :  { %s48_s8 = scalar_lea.vmem %s15_s7, 128  ;;  %p53_p1 = scmp.lt.s32.totalorder %s15_s7, %s15_s7 }
   0x4   :  { %p49_p0 = scmp.ne.s32.totalorder %s15_s7, %s48_s8  ;;  %p54_p2 = scmp.lt.s32.totalorder %s48_s8, %s48_s8 }
   0x6   :  { %p55_p3 = por %p54_p2, %p53_p1 }
   0x8   :  { %p56_p4 = pnand %p55_p3, %p49_p0 }
   0xa   :  { %59 = shalt.err (!%p56_p4)
}
   0xb   :  { %17 = dma.hbm_to_vmem [thread:$0]  %s102_s0, 128, %s15_s7, [#allocation3]  }
   0xc   :  { %80 = dma.done.wait [#allocation3], 128  }
   0xd   :  { %81 = vsyncadd [#allocation3], 4294967168  ;;  %s85_s11 = smov [#allocation5]   ;;  %v21_v0 = vld [vmem:[#allocation2] sm:$0xff] }
   0xe   :  { %s29_s12 = sshll.u32 %s85_s11, 4  ;;  %22 = vst [vmem:[#allocation5] sm:$0xff] %v21_v0  ;;  %s30_s12 = int_to_ptr.vmem [resolvable:$true] %s29_s12 }
   0xf   :  { %s60_s13 = scalar_lea.vmem %s30_s12, 128  ;;  %p65_p6 = scmp.lt.s32.totalorder %s30_s12, %s30_s12 }
  0x10   :  { %p61_p5 = scmp.ne.s32.totalorder %s30_s12, %s60_s13  ;;  %p66_p7 = scmp.lt.s32.totalorder %s60_s13, %s60_s13 }
  0x12   :  { %p67_p8 = por %p66_p7, %p65_p6 }
  0x14   :  { %p68_p9 = pnand %p67_p8, %p61_p5 }
  0x16   :  { %71 = shalt.err (!%p68_p9)
}
  0x17   :  { %32 = dma.vmem_to_hbm [thread:$0]  %s30_s12, 128, %s103_s1, [#allocation4]  }
  0x18   :  { %82 = dma.done.wait [#allocation4], 128  }
  0x19   :  { %83 = vsyncadd [#allocation4], 4294967168 }
  0x1a   :  { %36 = vsyncpa [#allocation3], 1 }
  0x1b   :  { %37 = vsyncpa [#allocation4], 1 }

</bundles_post_ra>
